<compile_context>
chip_gen: v6e
topology: v6e:2x2x1
jax: 0.10.0
libtpu: 0.0.40
codegen_flags: <defaults>
</compile_context>

<pallas_src>
from functools import partial

import jax
import jax.numpy as jnp
from jax.experimental import pallas as pl
from jax.experimental.pallas import tpu as pltpu

RADIUS = 1                       # box_filter radius (kernel 3x3, padding=dilation=radius)
_VMEM_LIMIT = 48 * 1024 * 1024   # explicit scoped-VMEM cap (> defaults, < v7x 64 MiB physical)


# ------------------------------------------------------------------ kernel 1: fused LR stage --
def _lr_fused_kernel(x_ref, y_ref, invn_ref, w1_ref, b1_ref, w2_ref, b2_ref, w3_ref,
                     ab_ref, *, h, w, r):
    """Fused box-stats + transposed 1x1-conv chain + b = mean_y - A*mean_x (one batch item).

    x_ref / y_ref : (1, C, M) flattened inputs, M = H*W (lane-dense, pixels on lanes)
    invn_ref      : (1, M)    1 / box count
    weights       : w1 (32, 2C) (BN1 scale folded), b1 (32,1), w2 (32,32) (BN2 scale folded),
                    b2 (32,1), w3 (C,32)
    ab_ref        : (1, 2C, M) output, rows [0:C] = A, rows [C:2C] = b
    """
    c = x_ref.shape[1]
    m = h * w

    # Boundary masks (column index for the horizontal taps, flat index for the vertical taps).
    idx = jax.lax.broadcasted_iota(jnp.int32, (1, m), 1)
    col = idx % w
    mask_l = col >= r                 # tap at col - r is in range
    mask_r = col < (w - r)            # tap at col + r is in range
    mask_u = idx >= r * w             # tap at row - r is in range
    mask_d = idx < (h - r) * w        # tap at row + r is in range

    x = x_ref[0]                      # (C, M)
    y = y_ref[0]
    # Stack all four box-filter operands so the separable box sum runs once on full vregs.
    s = jnp.concatenate([y, x, x * y, x * x], axis=0)     # (4C, M)

    def tap(t, shift, mask):
        # roll is circular; wrapped values are masked to zero (zero-padded box filter).
        return jnp.where(mask, pltpu.roll(t, shift, 1), 0.0)

    v = s + tap(s, r * w, mask_u) + tap(s, m - r * w, mask_d)   # vertical taps (-r, 0, +r rows)
    bs = v + tap(v, r, mask_l) + tap(v, m - r, mask_r)          # horizontal taps (-r, 0, +r cols)

    means = bs * invn_ref[...]        # (4C, M): [mean_y ; mean_x ; mean_xy ; mean_xx]
    my = means[0:c]
    mx = means[c:2 * c]
    # feat = [cov_xy ; var_x] = [mxy - mx*my ; mxx - mx*mx], kept stacked for one K=2C matmul.
    feat = means[2 * c:4 * c] - jnp.concatenate([mx, mx], axis=0) * means[0:2 * c]

    # Transposed 1x1-conv chain (pixels on the lane axis). BN scales pre-folded into weights.
    t = jnp.dot(w1_ref[...], feat, preferred_element_type=jnp.float32) + b1_ref[...]
    t = jnp.maximum(t, 0.0)
    t = jnp.dot(w2_ref[...], t, preferred_element_type=jnp.float32) + b2_ref[...]
    t = jnp.maximum(t, 0.0)
    a = jnp.dot(w3_ref[...], t, preferred_element_type=jnp.float32)   # (C, M)
    b = my - a * mx

    ab_ref[0] = jnp.concatenate([a, b], axis=0)    # single aligned (2C, M) store


def _inv_box_count(h, w, r):
    """1 / (dilated-3x3 box count with zero padding) -- batch independent, shape (1, H*W)."""
    onesp = jnp.pad(jnp.ones((h, w), jnp.float32), ((r, r), (r, r)))
    cnt = sum(onesp[dy:dy + h, dx:dx + w]
              for dy in (0, r, 2 * r) for dx in (0, r, 2 * r))
    return (1.0 / cnt).reshape(1, h * w)


def lr_fused(x_lr, y_lr, params):
    w1t, s1, b1, w2t, s2, b2, w3t = params
    n, c, h, w = x_lr.shape
    r = RADIUS
    m = h * w
    x3 = x_lr.reshape(n, c, m)        # contiguous reshape, no data movement
    y3 = y_lr.reshape(n, c, m)
    inv_n = _inv_box_count(h, w, r)
    # Fold eval-mode BatchNorm scales into the 1x1-conv weights (biases stay in the kernel).
    w1s = w1t * s1
    w2s = w2t * s2

    def const(a):
        shp = a.shape
        return pl.BlockSpec(shp, lambda b: (0,) * len(shp))

    img_spec = pl.BlockSpec((1, c, m), lambda b: (b, 0, 0))
    kernel = partial(_lr_fused_kernel, h=h, w=w, r=r)

    return pl.pallas_call(
        kernel,
        out_shape=jax.ShapeDtypeStruct((n, 2 * c, m), jnp.float32),
        grid_spec=pltpu.PrefetchScalarGridSpec(
            num_scalar_prefetch=0,
            grid=(n,),
            in_specs=[img_spec, img_spec, const(inv_n),
                      const(w1s), const(b1), const(w2s), const(b2), const(w3t)],
            out_specs=pl.BlockSpec((1, 2 * c, m), lambda b: (b, 0, 0)),
        ),
        compiler_params=pltpu.CompilerParams(
            dimension_semantics=("parallel",),
            vmem_limit_bytes=_VMEM_LIMIT),
    )(x3, y3, inv_n, w1s, b1, w2s, b2, w3t)


# ------------------------------------------------------ kernel 2: bilinear upsample + apply --
def _upsample_apply_kernel(ab_ref, rh_ref, rwt_ref, xhr_ref, o_ref, tw_ref):
    """Bilinear upsample (as bf16 matmuls) of [A ; b] fused with out = A_up*x_hr + b_up."""
    c2, hl, wl = ab_ref.shape[1], ab_ref.shape[2], ab_ref.shape[3]
    c = c2 // 2
    wh = rwt_ref.shape[1]

    # W-interp once per batch item: ab and rwt are constant across the H-tile ('arbitrary') axis.
    @pl.when(pl.program_id(1) == 0)
    def _():
        ab = ab_ref[0].astype(jnp.bfloat16).reshape(c2 * hl, wl)
        tw = jnp.dot(ab, rwt_ref[...], preferred_element_type=jnp.float32)
        tw_ref[...] = tw.reshape(c2, hl, wh).astype(jnp.bfloat16)

    rh = rh_ref[...]                  # (th, Hl) bf16 row-interp slab for this H tile
    xhr = xhr_ref[0]                  # (C, th, Wh) f32
    outs = []
    for p in range(c):                # unrolled per-plane H-interp: no broadcasted rh copies
        a_up = jnp.dot(rh, tw_ref[p], preferred_element_type=jnp.float32)
        b_up = jnp.dot(rh, tw_ref[c + p], preferred_element_type=jnp.float32)
        outs.append(a_up * xhr[p] + b_up)
    o_ref[0] = jnp.stack(outs, axis=0)   # single aligned (C, th, Wh) store


def _pick_h_tile(hh, wh, c, hl, budget_bytes=4 << 20):
    """HR rows per tile: largest multiple of 8 whose th-scaled VMEM footprint fits the budget.

    Per-row cost: x_hr block (x2 buffers) + out block (x2) + ~2 f32 compute intermediates per
    plane + rh blocks (bf16, x2). The grid uses cdiv, so th need not divide hh (ragged last
    block is handled by Pallas).
    """
    per_row = 6 * c * wh * 4 + 4 * hl
    th = budget_bytes // max(per_row, 1)
    if th >= hh:
        return hh
    return max(8, (th // 8) * 8)


def upsample_apply(ab4, x_hr, rh, rwt):
    n, c2, hl, wl = ab4.shape
    _, c, hh, wh = x_hr.shape
    th = _pick_h_tile(hh, wh, c, hl)
    grid = (n, pl.cdiv(hh, th))

    return pl.pallas_call(
        _upsample_apply_kernel,
        out_shape=jax.ShapeDtypeStruct((n, c, hh, wh), jnp.float32),
        grid_spec=pltpu.PrefetchScalarGridSpec(
            num_scalar_prefetch=0,
            grid=grid,
            in_specs=[
                pl.BlockSpec((1, c2, hl, wl), lambda b, i: (b, 0, 0, 0)),
                pl.BlockSpec((th, hl), lambda b, i: (i, 0)),
                pl.BlockSpec((wl, wh), lambda b, i: (0, 0)),
                pl.BlockSpec((1, c, th, wh), lambda b, i: (b, 0, i, 0)),
            ],
            out_specs=pl.BlockSpec((1, c, th, wh), lambda b, i: (b, 0, i, 0)),
            scratch_shapes=[pltpu.VMEM((c2, hl, wh), jnp.bfloat16)],
        ),
        compiler_params=pltpu.CompilerParams(
            dimension_semantics=("parallel", "arbitrary"),
            vmem_limit_bytes=_VMEM_LIMIT),
    )(ab4, rh, rwt, x_hr)


# ------------------------------------------------------------------------------------ glue --
def bilinear_matrix(out_size, in_size, dtype=jnp.float32):
    """M s.t. M @ v == F.interpolate(v, out_size, mode='bilinear', align_corners=True)."""
    if in_size == 1:                       # degenerate case: constant replicate
        return jnp.ones((out_size, 1), dtype)
    scale = (in_size - 1) / max(out_size - 1, 1)
    src = jnp.arange(out_size, dtype=jnp.float32) * scale
    i0 = jnp.clip(jnp.floor(src).astype(jnp.int32), 0, in_size - 2)
    frac = src - i0.astype(jnp.float32)
    rows = jnp.arange(out_size)
    m = jnp.zeros((out_size, in_size), dtype)
    m = m.at[rows, i0].add((1.0 - frac).astype(dtype))
    m = m.at[rows, i0 + 1].add(frac.astype(dtype))
    return m


def init_params(key):
    """Synthetic ConvGuidedFilter.conv_a parameters (1x1 convs + eval-mode folded BatchNorm)."""
    ks = jax.random.split(key, 7)
    eps = 1e-5
    w1t = 0.2 * jax.random.normal(ks[0], (32, 6), jnp.float32)    # Conv2d(6, 32, 1).weight
    w2t = 0.2 * jax.random.normal(ks[1], (32, 32), jnp.float32)   # Conv2d(32, 32, 1).weight
    w3t = 0.2 * jax.random.normal(ks[2], (3, 32), jnp.float32)    # Conv2d(32, 3, 1).weight
    gamma1 = 1.0 + 0.1 * jax.random.normal(ks[3], (32,), jnp.float32)
    beta1 = 0.1 * jax.random.normal(ks[4], (32,), jnp.float32)
    gamma2 = 1.0 + 0.1 * jax.random.normal(ks[5], (32,), jnp.float32)
    beta2 = 0.1 * jax.random.normal(ks[6], (32,), jnp.float32)
    # BN eval-mode fold with running_mean=0, running_var=1.
    s1 = (gamma1 / jnp.sqrt(1.0 + eps)).reshape(32, 1)
    b1 = beta1.reshape(32, 1)
    s2 = (gamma2 / jnp.sqrt(1.0 + eps)).reshape(32, 1)
    b2 = beta2.reshape(32, 1)
    return (w1t, s1, b1, w2t, s2, b2, w3t)


def conv_guided_filter(x_lr, y_lr, x_hr, params):
    n, c, hl, wl = x_lr.shape
    _, _, hh, wh = x_hr.shape
    ab = lr_fused(x_lr, y_lr, params)             # (N, 2C, Hl*Wl): [A ; b], lane-dense, f32
    ab4 = ab.reshape(n, 2 * c, hl, wl)            # contiguous reshape, no data movement
    rh = bilinear_matrix(hh, hl).astype(jnp.bfloat16)
    rwt = bilinear_matrix(wh, wl).T.astype(jnp.bfloat16)
    return upsample_apply(ab4, x_hr, rh, rwt)


# ------------------------------------------------------------------------ pure-JAX reference --
def reference(x_lr, y_lr, x_hr, params):
    w1t, s1, b1, w2t, s2, b2, w3t = params
    r = RADIUS
    n, c, hl, wl = x_lr.shape
    _, _, hh, wh = x_hr.shape

    def box(t):
        tp = jnp.pad(t, ((0, 0), (0, 0), (r, r), (r, r)))
        return sum(tp[:, :, dy:dy + hl, dx:dx + wl]
                   for dy in (0, r, 2 * r) for dx in (0, r, 2 * r))

    cnt = box(jnp.ones((1, c, hl, wl), jnp.float32))
    mx = box(x_lr) / cnt
    my = box(y_lr) / cnt
    cov = box(x_lr * y_lr) / cnt - mx * my
    var = box(x_lr * x_lr) / cnt - mx * mx
    feat = jnp.concatenate([cov, var], axis=1).reshape(n, 2 * c, hl * wl)
    h1 = jnp.maximum(jnp.einsum('oc,ncm->nom', w1t, feat) * s1[None] + b1[None], 0.0)
    h2 = jnp.maximum(jnp.einsum('oc,ncm->nom', w2t, h1) * s2[None] + b2[None], 0.0)
    a = jnp.einsum('oc,ncm->nom', w3t, h2).reshape(n, c, hl, wl)
    b = my - a * mx
    rh = bilinear_matrix(hh, hl)
    rwt = bilinear_matrix(wh, wl).T
    up = lambda t: jnp.einsum('hj,ncjk,kw->nchw', rh, t, rwt)
    return up(a) * x_hr + up(b)


if __name__ == "__main__":
    key = jax.random.PRNGKey(0)
    kx, ky, kh, kp = jax.random.split(key, 4)
    x_lr = jax.random.uniform(kx, (2, 3, 16, 16), dtype=jnp.float32)
    y_lr = jax.random.uniform(ky, (2, 3, 16, 16), dtype=jnp.float32)
    x_hr = jax.random.uniform(kh, (2, 3, 32, 32), dtype=jnp.float32)
    params = init_params(kp)

    out = jax.jit(conv_guided_filter)(x_lr, y_lr, x_hr, params)
    out = jax.block_until_ready(out)

    assert out.shape == (2, 3, 32, 32)
    assert bool(jnp.all(jnp.isfinite(out)))
    ref = reference(x_lr, y_lr, x_hr, params)
    assert bool(jnp.allclose(out, ref, atol=2e-2, rtol=2e-2)), \
        float(jnp.max(jnp.abs(out - ref)))
    print("KERNEL_OK")
</pallas_src>

<mosaic_0001>
module attributes {stable_mosaic.version = 11 : i64} {
  func.func private @main(%arg0: i32) attributes {dimension_semantics = [#tpu.dimension_semantics<core_parallel>], iteration_bounds = array<i64: 2>, tpu.core_type = #tpu.core_type<sc_scalar_subcore>, window_params = []} {
    return
  }
}

module attributes {stable_mosaic.version = 11 : i64} {
  func.func private @main(%arg0: i32) attributes {dimension_semantics = [#tpu.dimension_semantics<core_parallel>], iteration_bounds = array<i64: 2>, tpu.core_type = #tpu.core_type<sc_scalar_subcore>, window_params = []} {
    return
  }
}

module attributes {stable_mosaic.version = 11 : i64} {
  func.func @_lr_fused_kernel(%arg0: i32, %arg1: memref<1x3x256xf32, #tpu.memory_space<vmem>>, %arg2: memref<1x3x256xf32, #tpu.memory_space<vmem>>, %arg3: memref<1x256xf32, #tpu.memory_space<vmem>>, %arg4: memref<32x6xf32, #tpu.memory_space<vmem>>, %arg5: memref<32x1xf32, #tpu.memory_space<vmem>>, %arg6: memref<32x32xf32, #tpu.memory_space<vmem>>, %arg7: memref<32x1xf32, #tpu.memory_space<vmem>>, %arg8: memref<3x32xf32, #tpu.memory_space<vmem>>, %arg9: memref<1x6x256xf32, #tpu.memory_space<vmem>>) attributes {dimension_semantics = [#tpu.dimension_semantics<parallel>], iteration_bounds = array<i64: 2>, scalar_prefetch = 0 : i64, scratch_operands = 0 : i64, tpu.core_type = #tpu.core_type<tc>, window_params = [{transform_indices = @transform_0, window_bounds = array<i64: 1, 3, 256>}, {transform_indices = @transform_1, window_bounds = array<i64: 1, 3, 256>}, {pipeline_mode = #tpu.pipeline_mode<synchronous>, transform_indices = @transform_2, window_bounds = array<i64: 1, 256>}, {pipeline_mode = #tpu.pipeline_mode<synchronous>, transform_indices = @transform_3, window_bounds = array<i64: 32, 6>}, {pipeline_mode = #tpu.pipeline_mode<synchronous>, transform_indices = @transform_4, window_bounds = array<i64: 32, 1>}, {pipeline_mode = #tpu.pipeline_mode<synchronous>, transform_indices = @transform_5, window_bounds = array<i64: 32, 32>}, {pipeline_mode = #tpu.pipeline_mode<synchronous>, transform_indices = @transform_6, window_bounds = array<i64: 32, 1>}, {pipeline_mode = #tpu.pipeline_mode<synchronous>, transform_indices = @transform_7, window_bounds = array<i64: 3, 32>}, {transform_indices = @transform_8, window_bounds = array<i64: 1, 6, 256>}]} {
    %0 = tpu.iota {dimensions = array<i32: 1>} : vector<1x256xi32>
    %c16_i32 = arith.constant 16 : i32
    %c0_i32 = arith.constant 0 : i32
    %1 = arith.cmpi eq, %c16_i32, %c0_i32 : i32
    %c1_i32 = arith.constant 1 : i32
    %2 = arith.select %1, %c1_i32, %c16_i32 : i32
    %3 = vector.broadcast %2 : i32 to vector<1x256xi32>
    %4 = arith.remsi %0, %3 : vector<1x256xi32>
    %c0_i32_0 = arith.constant 0 : i32
    %5 = vector.broadcast %c0_i32_0 : i32 to vector<1x256xi32>
    %6 = arith.cmpi ne, %4, %5 : vector<1x256xi32>
    %c0_i32_1 = arith.constant 0 : i32
    %7 = vector.broadcast %c0_i32_1 : i32 to vector<1x256xi32>
    %8 = arith.cmpi slt, %4, %7 : vector<1x256xi32>
    %c0_i32_2 = arith.constant 0 : i32
    %9 = arith.cmpi slt, %2, %c0_i32_2 : i32
    %10 = vector.broadcast %9 : i1 to vector<1x256xi1>
    %11 = vector.broadcast %10 : vector<1x256xi1> to vector<1x256xi1>
    %12 = arith.xori %8, %11 : vector<1x256xi1>
    %13 = arith.andi %12, %6 : vector<1x256xi1>
    %14 = vector.broadcast %2 : i32 to vector<1x256xi32>
    %15 = arith.addi %4, %14 : vector<1x256xi32>
    %16 = arith.select %13, %15, %4 : vector<1x256xi1>, vector<1x256xi32>
    %c1_i32_3 = arith.constant 1 : i32
    %17 = vector.broadcast %c1_i32_3 : i32 to vector<1x256xi32>
    %18 = arith.cmpi sge, %16, %17 : vector<1x256xi32>
    %c15_i32 = arith.constant 15 : i32
    %19 = vector.broadcast %c15_i32 : i32 to vector<1x256xi32>
    %20 = arith.cmpi slt, %16, %19 : vector<1x256xi32>
    %c16_i32_4 = arith.constant 16 : i32
    %21 = vector.broadcast %c16_i32_4 : i32 to vector<1x256xi32>
    %22 = arith.cmpi sge, %0, %21 : vector<1x256xi32>
    %c240_i32 = arith.constant 240 : i32
    %23 = vector.broadcast %c240_i32 : i32 to vector<1x256xi32>
    %24 = arith.cmpi slt, %0, %23 : vector<1x256xi32>
    %c0 = arith.constant 0 : index
    %c0_5 = arith.constant 0 : index
    %c0_6 = arith.constant 0 : index
    %25 = vector.load %arg1[%c0, %c0_5, %c0_6] : memref<1x3x256xf32, #tpu.memory_space<vmem>>, vector<1x3x256xf32>
    %26 = vector.shape_cast %25 : vector<1x3x256xf32> to vector<3x256xf32>
    %c0_7 = arith.constant 0 : index
    %c0_8 = arith.constant 0 : index
    %c0_9 = arith.constant 0 : index
    %27 = vector.load %arg2[%c0_7, %c0_8, %c0_9] : memref<1x3x256xf32, #tpu.memory_space<vmem>>, vector<1x3x256xf32>
    %28 = vector.shape_cast %27 : vector<1x3x256xf32> to vector<3x256xf32>
    %29 = arith.mulf %26, %28 : vector<3x256xf32>
    %30 = arith.mulf %26, %26 : vector<3x256xf32>
    %31 = tpu.concatenate %28, %26, %29, %30 in 0 : vector<3x256xf32>, vector<3x256xf32>, vector<3x256xf32>, vector<3x256xf32> -> vector<12x256xf32>
    %c16_i32_10 = arith.constant 16 : i32
    %32 = tpu.dynamic_rotate %31 by %c16_i32_10 dim 1 : vector<12x256xf32>, i32 -> vector<12x256xf32>
    %cst = arith.constant 0.000000e+00 : f32
    %33 = vector.shape_cast %22 : vector<1x256xi1> to vector<1x256xi1>
    %34 = vector.broadcast %33 : vector<1x256xi1> to vector<12x256xi1>
    %35 = vector.broadcast %cst : f32 to vector<12x256xf32>
    %36 = arith.select %34, %32, %35 : vector<12x256xi1>, vector<12x256xf32>
    %37 = arith.addf %31, %36 : vector<12x256xf32>
    %c240_i32_11 = arith.constant 240 : i32
    %38 = tpu.dynamic_rotate %31 by %c240_i32_11 dim 1 : vector<12x256xf32>, i32 -> vector<12x256xf32>
    %cst_12 = arith.constant 0.000000e+00 : f32
    %39 = vector.shape_cast %24 : vector<1x256xi1> to vector<1x256xi1>
    %40 = vector.broadcast %39 : vector<1x256xi1> to vector<12x256xi1>
    %41 = vector.broadcast %cst_12 : f32 to vector<12x256xf32>
    %42 = arith.select %40, %38, %41 : vector<12x256xi1>, vector<12x256xf32>
    %43 = arith.addf %37, %42 : vector<12x256xf32>
    %c1_i32_13 = arith.constant 1 : i32
    %44 = tpu.dynamic_rotate %43 by %c1_i32_13 dim 1 : vector<12x256xf32>, i32 -> vector<12x256xf32>
    %cst_14 = arith.constant 0.000000e+00 : f32
    %45 = vector.shape_cast %18 : vector<1x256xi1> to vector<1x256xi1>
    %46 = vector.broadcast %45 : vector<1x256xi1> to vector<12x256xi1>
    %47 = vector.broadcast %cst_14 : f32 to vector<12x256xf32>
    %48 = arith.select %46, %44, %47 : vector<12x256xi1>, vector<12x256xf32>
    %49 = arith.addf %43, %48 : vector<12x256xf32>
    %c255_i32 = arith.constant 255 : i32
    %50 = tpu.dynamic_rotate %43 by %c255_i32 dim 1 : vector<12x256xf32>, i32 -> vector<12x256xf32>
    %cst_15 = arith.constant 0.000000e+00 : f32
    %51 = vector.shape_cast %20 : vector<1x256xi1> to vector<1x256xi1>
    %52 = vector.broadcast %51 : vector<1x256xi1> to vector<12x256xi1>
    %53 = vector.broadcast %cst_15 : f32 to vector<12x256xf32>
    %54 = arith.select %52, %50, %53 : vector<12x256xi1>, vector<12x256xf32>
    %55 = arith.addf %49, %54 : vector<12x256xf32>
    %c0_16 = arith.constant 0 : index
    %c0_17 = arith.constant 0 : index
    %56 = vector.load %arg3[%c0_16, %c0_17] : memref<1x256xf32, #tpu.memory_space<vmem>>, vector<1x256xf32>
    %57 = vector.broadcast %56 : vector<1x256xf32> to vector<12x256xf32>
    %58 = arith.mulf %55, %57 : vector<12x256xf32>
    %59 = vector.extract_strided_slice %58 {offsets = [0, 0], sizes = [3, 256], strides = [1, 1]} : vector<12x256xf32> to vector<3x256xf32>
    %60 = vector.extract_strided_slice %58 {offsets = [3, 0], sizes = [3, 256], strides = [1, 1]} : vector<12x256xf32> to vector<3x256xf32>
    %61 = vector.extract_strided_slice %58 {offsets = [6, 0], sizes = [6, 256], strides = [1, 1]} : vector<12x256xf32> to vector<6x256xf32>
    %62 = tpu.concatenate %60, %60 in 0 : vector<3x256xf32>, vector<3x256xf32> -> vector<6x256xf32>
    %63 = vector.extract_strided_slice %58 {offsets = [0, 0], sizes = [6, 256], strides = [1, 1]} : vector<12x256xf32> to vector<6x256xf32>
    %64 = arith.mulf %62, %63 : vector<6x256xf32>
    %65 = arith.subf %61, %64 : vector<6x256xf32>
    %c0_18 = arith.constant 0 : index
    %c0_19 = arith.constant 0 : index
    %66 = vector.load %arg4[%c0_18, %c0_19] : memref<32x6xf32, #tpu.memory_space<vmem>>, vector<32x6xf32>
    %cst_20 = arith.constant dense<0.000000e+00> : vector<32x256xf32>
    %67 = tpu.matmul %66, %65, %cst_20 {dimension_numbers = #tpu.dot_dimension_numbers<[1], [0], [0], [1], [0, 0, 1, 1], [], []>} : vector<32x6xf32>, vector<6x256xf32>, vector<32x256xf32> -> vector<32x256xf32>
    %c0_21 = arith.constant 0 : index
    %c0_22 = arith.constant 0 : index
    %68 = vector.load %arg5[%c0_21, %c0_22] : memref<32x1xf32, #tpu.memory_space<vmem>>, vector<32x1xf32>
    %69 = vector.broadcast %68 : vector<32x1xf32> to vector<32x256xf32>
    %70 = arith.addf %67, %69 : vector<32x256xf32>
    %cst_23 = arith.constant 0.000000e+00 : f32
    %71 = vector.broadcast %cst_23 : f32 to vector<32x256xf32>
    %72 = arith.maximumf %70, %71 : vector<32x256xf32>
    %c0_24 = arith.constant 0 : index
    %c0_25 = arith.constant 0 : index
    %73 = vector.load %arg6[%c0_24, %c0_25] : memref<32x32xf32, #tpu.memory_space<vmem>>, vector<32x32xf32>
    %cst_26 = arith.constant dense<0.000000e+00> : vector<32x256xf32>
    %74 = tpu.matmul %73, %72, %cst_26 {dimension_numbers = #tpu.dot_dimension_numbers<[1], [0], [0], [1], [0, 0, 1, 1], [], []>} : vector<32x32xf32>, vector<32x256xf32>, vector<32x256xf32> -> vector<32x256xf32>
    %c0_27 = arith.constant 0 : index
    %c0_28 = arith.constant 0 : index
    %75 = vector.load %arg7[%c0_27, %c0_28] : memref<32x1xf32, #tpu.memory_space<vmem>>, vector<32x1xf32>
    %76 = vector.broadcast %75 : vector<32x1xf32> to vector<32x256xf32>
    %77 = arith.addf %74, %76 : vector<32x256xf32>
    %cst_29 = arith.constant 0.000000e+00 : f32
    %78 = vector.broadcast %cst_29 : f32 to vector<32x256xf32>
    %79 = arith.maximumf %77, %78 : vector<32x256xf32>
    %c0_30 = arith.constant 0 : index
    %c0_31 = arith.constant 0 : index
    %80 = vector.load %arg8[%c0_30, %c0_31] : memref<3x32xf32, #tpu.memory_space<vmem>>, vector<3x32xf32>
    %cst_32 = arith.constant dense<0.000000e+00> : vector<3x256xf32>
    %81 = tpu.matmul %80, %79, %cst_32 {dimension_numbers = #tpu.dot_dimension_numbers<[1], [0], [0], [1], [0, 0, 1, 1], [], []>} : vector<3x32xf32>, vector<32x256xf32>, vector<3x256xf32> -> vector<3x256xf32>
    %82 = arith.mulf %81, %60 : vector<3x256xf32>
    %83 = arith.subf %59, %82 : vector<3x256xf32>
    %84 = tpu.concatenate %81, %83 in 0 : vector<3x256xf32>, vector<3x256xf32> -> vector<6x256xf32>
    %c0_33 = arith.constant 0 : index
    %c0_34 = arith.constant 0 : index
    %c0_35 = arith.constant 0 : index
    %85 = vector.load %arg9[%c0_33, %c0_34, %c0_35] : memref<1x6x256xf32, #tpu.memory_space<vmem>>, vector<1x6x256xf32>
    %86 = vector.shape_cast %85 : vector<1x6x256xf32> to vector<6x256xf32>
    %87 = vector.shape_cast %84 : vector<6x256xf32> to vector<1x6x256xf32>
    tpu.vector_store %arg9[%c0_33, %c0_34, %c0_35], %87 {strides = array<i32>} : memref<1x6x256xf32, #tpu.memory_space<vmem>>, vector<1x6x256xf32>,
    return
  }
  func.func @transform_0(%arg0: i32) -> (i32, i32, i32) {
    %c0_i32 = arith.constant 0 : i32
    %c0_i32_0 = arith.constant 0 : i32
    %c0_i32_1 = arith.constant 0 : i32
    return %arg0, %c0_i32, %c0_i32_0 : i32, i32, i32
  }
  func.func @transform_1(%arg0: i32) -> (i32, i32, i32) {
    %c0_i32 = arith.constant 0 : i32
    %c0_i32_0 = arith.constant 0 : i32
    %c0_i32_1 = arith.constant 0 : i32
    return %arg0, %c0_i32, %c0_i32_0 : i32, i32, i32
  }
  func.func @transform_2(%arg0: i32) -> (i32, i32) {
    %c0_i32 = arith.constant 0 : i32
    %c0_i32_0 = arith.constant 0 : i32
    %c0_i32_1 = arith.constant 0 : i32
    return %c0_i32, %c0_i32_0 : i32, i32
  }
  func.func @transform_3(%arg0: i32) -> (i32, i32) {
    %c0_i32 = arith.constant 0 : i32
    %c0_i32_0 = arith.constant 0 : i32
    %c0_i32_1 = arith.constant 0 : i32
    return %c0_i32, %c0_i32_0 : i32, i32
  }
  func.func @transform_4(%arg0: i32) -> (i32, i32) {
    %c0_i32 = arith.constant 0 : i32
    %c0_i32_0 = arith.constant 0 : i32
    %c0_i32_1 = arith.constant 0 : i32
    return %c0_i32, %c0_i32_0 : i32, i32
  }
  func.func @transform_5(%arg0: i32) -> (i32, i32) {
    %c0_i32 = arith.constant 0 : i32
    %c0_i32_0 = arith.constant 0 : i32
    %c0_i32_1 = arith.constant 0 : i32
    return %c0_i32, %c0_i32_0 : i32, i32
  }
  func.func @transform_6(%arg0: i32) -> (i32, i32) {
    %c0_i32 = arith.constant 0 : i32
    %c0_i32_0 = arith.constant 0 : i32
    %c0_i32_1 = arith.constant 0 : i32
    return %c0_i32, %c0_i32_0 : i32, i32
  }
  func.func @transform_7(%arg0: i32) -> (i32, i32) {
    %c0_i32 = arith.constant 0 : i32
    %c0_i32_0 = arith.constant 0 : i32
    %c0_i32_1 = arith.constant 0 : i32
    return %c0_i32, %c0_i32_0 : i32, i32
  }
  func.func @transform_8(%arg0: i32) -> (i32, i32, i32) {
    %c0_i32 = arith.constant 0 : i32
    %c0_i32_0 = arith.constant 0 : i32
    %c0_i32_1 = arith.constant 0 : i32
    return %arg0, %c0_i32, %c0_i32_0 : i32, i32, i32
  }
}

module attributes {stable_mosaic.version = 11 : i64} {
  func.func @_upsample_apply_kernel(%arg0: i32, %arg1: i32, %arg2: memref<1x6x16x16xf32, #tpu.memory_space<vmem>>, %arg3: memref<32x16xbf16, #tpu.memory_space<vmem>>, %arg4: memref<16x32xbf16, #tpu.memory_space<vmem>>, %arg5: memref<1x3x32x32xf32, #tpu.memory_space<vmem>>, %arg6: memref<1x3x32x32xf32, #tpu.memory_space<vmem>>, %arg7: memref<6x16x32xbf16, #tpu.memory_space<vmem>>) attributes {dimension_semantics = [#tpu.dimension_semantics<parallel>, #tpu.dimension_semantics<arbitrary>], iteration_bounds = array<i64: 2, 1>, scalar_prefetch = 0 : i64, scratch_operands = 1 : i64, tpu.core_type = #tpu.core_type<tc>, window_params = [{transform_indices = @transform_0, window_bounds = array<i64: 1, 6, 16, 16>}, {transform_indices = @transform_1, window_bounds = array<i64: 32, 16>}, {pipeline_mode = #tpu.pipeline_mode<synchronous>, transform_indices = @transform_2, window_bounds = array<i64: 16, 32>}, {transform_indices = @transform_3, window_bounds = array<i64: 1, 3, 32, 32>}, {transform_indices = @transform_4, window_bounds = array<i64: 1, 3, 32, 32>}]} {
    %c0_i32 = arith.constant 0 : i32
    %0 = arith.cmpi eq, %arg1, %c0_i32 : i32
    %1 = arith.extui %0 : i1 to i32
    %c0_i32_0 = arith.constant 0 : i32
    %2 = arith.cmpi ne, %1, %c0_i32_0 : i32
    scf.if %2 {
      %c0_28 = arith.constant 0 : index
      %c0_29 = arith.constant 0 : index
      %c0_30 = arith.constant 0 : index
      %c0_31 = arith.constant 0 : index
      %43 = vector.load %arg2[%c0_28, %c0_29, %c0_30, %c0_31] : memref<1x6x16x16xf32, #tpu.memory_space<vmem>>, vector<1x6x16x16xf32>
      %44 = vector.shape_cast %43 : vector<1x6x16x16xf32> to vector<6x16x16xf32>
      %45 = arith.truncf %44 : vector<6x16x16xf32> to vector<6x16x16xbf16>
      %46 = vector.shape_cast %45 : vector<6x16x16xbf16> to vector<96x16xbf16>
      %c0_32 = arith.constant 0 : index
      %c0_33 = arith.constant 0 : index
      %47 = vector.load %arg4[%c0_32, %c0_33] : memref<16x32xbf16, #tpu.memory_space<vmem>>, vector<16x32xbf16>
      %cst_34 = arith.constant dense<0.000000e+00> : vector<96x32xf32>
      %48 = tpu.matmul %46, %47, %cst_34 {dimension_numbers = #tpu.dot_dimension_numbers<[1], [0], [0], [1], [0, 0, 1, 1], [], []>} : vector<96x16xbf16>, vector<16x32xbf16>, vector<96x32xf32> -> vector<96x32xf32>
      %49 = vector.shape_cast %48 : vector<96x32xf32> to vector<6x16x32xf32>
      %50 = arith.truncf %49 : vector<6x16x32xf32> to vector<6x16x32xbf16>
      %c0_35 = arith.constant 0 : index
      %c0_36 = arith.constant 0 : index
      %c0_37 = arith.constant 0 : index
      %51 = vector.load %arg7[%c0_35, %c0_36, %c0_37] : memref<6x16x32xbf16, #tpu.memory_space<vmem>>, vector<6x16x32xbf16>
      tpu.vector_store %arg7[%c0_35, %c0_36, %c0_37], %50 {strides = array<i32>} : memref<6x16x32xbf16, #tpu.memory_space<vmem>>, vector<6x16x32xbf16>,
    } else {
    }
    %c0 = arith.constant 0 : index
    %c0_1 = arith.constant 0 : index
    %3 = vector.load %arg3[%c0, %c0_1] : memref<32x16xbf16, #tpu.memory_space<vmem>>, vector<32x16xbf16>
    %c0_2 = arith.constant 0 : index
    %c0_3 = arith.constant 0 : index
    %c0_4 = arith.constant 0 : index
    %c0_5 = arith.constant 0 : index
    %4 = vector.load %arg5[%c0_2, %c0_3, %c0_4, %c0_5] : memref<1x3x32x32xf32, #tpu.memory_space<vmem>>, vector<1x3x32x32xf32>
    %5 = vector.shape_cast %4 : vector<1x3x32x32xf32> to vector<3x32x32xf32>
    %c0_6 = arith.constant 0 : index
    %c0_7 = arith.constant 0 : index
    %c0_8 = arith.constant 0 : index
    %6 = vector.load %arg7[%c0_6, %c0_7, %c0_8] : memref<6x16x32xbf16, #tpu.memory_space<vmem>>, vector<1x16x32xbf16>
    %7 = vector.shape_cast %6 : vector<1x16x32xbf16> to vector<16x32xbf16>
    %cst = arith.constant dense<0.000000e+00> : vector<32x32xf32>
    %8 = tpu.matmul %3, %7, %cst {dimension_numbers = #tpu.dot_dimension_numbers<[1], [0], [0], [1], [0, 0, 1, 1], [], []>} : vector<32x16xbf16>, vector<16x32xbf16>, vector<32x32xf32> -> vector<32x32xf32>
    %c3 = arith.constant 3 : index
    %c0_9 = arith.constant 0 : index
    %c0_10 = arith.constant 0 : index
    %9 = vector.load %arg7[%c3, %c0_9, %c0_10] : memref<6x16x32xbf16, #tpu.memory_space<vmem>>, vector<1x16x32xbf16>
    %10 = vector.shape_cast %9 : vector<1x16x32xbf16> to vector<16x32xbf16>
    %cst_11 = arith.constant dense<0.000000e+00> : vector<32x32xf32>
    %11 = tpu.matmul %3, %10, %cst_11 {dimension_numbers = #tpu.dot_dimension_numbers<[1], [0], [0], [1], [0, 0, 1, 1], [], []>} : vector<32x16xbf16>, vector<16x32xbf16>, vector<32x32xf32> -> vector<32x32xf32>
    %12 = vector.extract_strided_slice %5 {offsets = [0, 0, 0], sizes = [1, 32, 32], strides = [1, 1, 1]} : vector<3x32x32xf32> to vector<1x32x32xf32>
    %13 = vector.shape_cast %12 : vector<1x32x32xf32> to vector<32x32xf32>
    %14 = arith.mulf %8, %13 : vector<32x32xf32>
    %15 = arith.addf %14, %11 : vector<32x32xf32>
    %c1 = arith.constant 1 : index
    %c0_12 = arith.constant 0 : index
    %c0_13 = arith.constant 0 : index
    %16 = vector.load %arg7[%c1, %c0_12, %c0_13] : memref<6x16x32xbf16, #tpu.memory_space<vmem>>, vector<1x16x32xbf16>
    %17 = vector.shape_cast %16 : vector<1x16x32xbf16> to vector<16x32xbf16>
    %cst_14 = arith.constant dense<0.000000e+00> : vector<32x32xf32>
    %18 = tpu.matmul %3, %17, %cst_14 {dimension_numbers = #tpu.dot_dimension_numbers<[1], [0], [0], [1], [0, 0, 1, 1], [], []>} : vector<32x16xbf16>, vector<16x32xbf16>, vector<32x32xf32> -> vector<32x32xf32>
    %c4 = arith.constant 4 : index
    %c0_15 = arith.constant 0 : index
    %c0_16 = arith.constant 0 : index
    %19 = vector.load %arg7[%c4, %c0_15, %c0_16] : memref<6x16x32xbf16, #tpu.memory_space<vmem>>, vector<1x16x32xbf16>
    %20 = vector.shape_cast %19 : vector<1x16x32xbf16> to vector<16x32xbf16>
    %cst_17 = arith.constant dense<0.000000e+00> : vector<32x32xf32>
    %21 = tpu.matmul %3, %20, %cst_17 {dimension_numbers = #tpu.dot_dimension_numbers<[1], [0], [0], [1], [0, 0, 1, 1], [], []>} : vector<32x16xbf16>, vector<16x32xbf16>, vector<32x32xf32> -> vector<32x32xf32>
    %22 = vector.extract_strided_slice %5 {offsets = [1, 0, 0], sizes = [1, 32, 32], strides = [1, 1, 1]} : vector<3x32x32xf32> to vector<1x32x32xf32>
    %23 = vector.shape_cast %22 : vector<1x32x32xf32> to vector<32x32xf32>
    %24 = arith.mulf %18, %23 : vector<32x32xf32>
    %25 = arith.addf %24, %21 : vector<32x32xf32>
    %c2 = arith.constant 2 : index
    %c0_18 = arith.constant 0 : index
    %c0_19 = arith.constant 0 : index
    %26 = vector.load %arg7[%c2, %c0_18, %c0_19] : memref<6x16x32xbf16, #tpu.memory_space<vmem>>, vector<1x16x32xbf16>
    %27 = vector.shape_cast %26 : vector<1x16x32xbf16> to vector<16x32xbf16>
    %cst_20 = arith.constant dense<0.000000e+00> : vector<32x32xf32>
    %28 = tpu.matmul %3, %27, %cst_20 {dimension_numbers = #tpu.dot_dimension_numbers<[1], [0], [0], [1], [0, 0, 1, 1], [], []>} : vector<32x16xbf16>, vector<16x32xbf16>, vector<32x32xf32> -> vector<32x32xf32>
    %c5 = arith.constant 5 : index
    %c0_21 = arith.constant 0 : index
    %c0_22 = arith.constant 0 : index
    %29 = vector.load %arg7[%c5, %c0_21, %c0_22] : memref<6x16x32xbf16, #tpu.memory_space<vmem>>, vector<1x16x32xbf16>
    %30 = vector.shape_cast %29 : vector<1x16x32xbf16> to vector<16x32xbf16>
    %cst_23 = arith.constant dense<0.000000e+00> : vector<32x32xf32>
    %31 = tpu.matmul %3, %30, %cst_23 {dimension_numbers = #tpu.dot_dimension_numbers<[1], [0], [0], [1], [0, 0, 1, 1], [], []>} : vector<32x16xbf16>, vector<16x32xbf16>, vector<32x32xf32> -> vector<32x32xf32>
    %32 = vector.extract_strided_slice %5 {offsets = [2, 0, 0], sizes = [1, 32, 32], strides = [1, 1, 1]} : vector<3x32x32xf32> to vector<1x32x32xf32>
    %33 = vector.shape_cast %32 : vector<1x32x32xf32> to vector<32x32xf32>
    %34 = arith.mulf %28, %33 : vector<32x32xf32>
    %35 = arith.addf %34, %31 : vector<32x32xf32>
    %36 = vector.shape_cast %15 : vector<32x32xf32> to vector<1x32x32xf32>
    %37 = vector.shape_cast %25 : vector<32x32xf32> to vector<1x32x32xf32>
    %38 = vector.shape_cast %35 : vector<32x32xf32> to vector<1x32x32xf32>
    %39 = tpu.concatenate %36, %37, %38 in 0 : vector<1x32x32xf32>, vector<1x32x32xf32>, vector<1x32x32xf32> -> vector<3x32x32xf32>
    %c0_24 = arith.constant 0 : index
    %c0_25 = arith.constant 0 : index
    %c0_26 = arith.constant 0 : index
    %c0_27 = arith.constant 0 : index
    %40 = vector.load %arg6[%c0_24, %c0_25, %c0_26, %c0_27] : memref<1x3x32x32xf32, #tpu.memory_space<vmem>>, vector<1x3x32x32xf32>
    %41 = vector.shape_cast %40 : vector<1x3x32x32xf32> to vector<3x32x32xf32>
    %42 = vector.shape_cast %39 : vector<3x32x32xf32> to vector<1x3x32x32xf32>
    tpu.vector_store %arg6[%c0_24, %c0_25, %c0_26, %c0_27], %42 {strides = array<i32>} : memref<1x3x32x32xf32, #tpu.memory_space<vmem>>, vector<1x3x32x32xf32>,
    return
  }
  func.func @transform_0(%arg0: i32, %arg1: i32) -> (i32, i32, i32, i32) {
    %c0_i32 = arith.constant 0 : i32
    %c0_i32_0 = arith.constant 0 : i32
    %c0_i32_1 = arith.constant 0 : i32
    %c0_i32_2 = arith.constant 0 : i32
    return %arg0, %c0_i32, %c0_i32_0, %c0_i32_1 : i32, i32, i32, i32
  }
  func.func @transform_1(%arg0: i32, %arg1: i32) -> (i32, i32) {
    %c0_i32 = arith.constant 0 : i32
    %c0_i32_0 = arith.constant 0 : i32
    return %arg1, %c0_i32 : i32, i32
  }
  func.func @transform_2(%arg0: i32, %arg1: i32) -> (i32, i32) {
    %c0_i32 = arith.constant 0 : i32
    %c0_i32_0 = arith.constant 0 : i32
    %c0_i32_1 = arith.constant 0 : i32
    return %c0_i32, %c0_i32_0 : i32, i32
  }
  func.func @transform_3(%arg0: i32, %arg1: i32) -> (i32, i32, i32, i32) {
    %c0_i32 = arith.constant 0 : i32
    %c0_i32_0 = arith.constant 0 : i32
    %c0_i32_1 = arith.constant 0 : i32
    return %arg0, %c0_i32, %arg1, %c0_i32_0 : i32, i32, i32, i32
  }
  func.func @transform_4(%arg0: i32, %arg1: i32) -> (i32, i32, i32, i32) {
    %c0_i32 = arith.constant 0 : i32
    %c0_i32_0 = arith.constant 0 : i32
    %c0_i32_1 = arith.constant 0 : i32
    return %arg0, %c0_i32, %arg1, %c0_i32_0 : i32, i32, i32, i32
  }
}

</mosaic_0001>

<bundles_post_ra>
// kernel: conv_guided_filter.2
= control target key start
LH: loop header
LB: loop body
LE: loop exit
PB: predicated region body
PF: predicated region fallthrough
CT: control target
= control target key end

     0   :  { %s1082_s27 = smov 0   ;;  %s1313_s0 = inlined_call_operand.vmem [shape: f32[2,3,256], index: 0, kind: input, shape index: {}]   ;;  %s1314_s1 = inlined_call_operand.vmem [shape: f32[2,3,256], index: 1, kind: input, shape index: {}]   ;;  %s1315_s2 = inlined_call_operand.vmem [shape: f32[1,256], index: 2, kind: input, shape index: {}]   ;;  %s1316_s3 = inlined_call_operand.vmem [shape: f32[32,6], index: 3, kind: input, shape index: {}]   ;;  %s1317_s4 = inlined_call_operand.vmem [shape: f32[32,1], index: 4, kind: input, shape index: {}]   ;;  %s1318_s5 = inlined_call_operand.vmem [shape: f32[32,32], index: 5, kind: input, shape index: {}]   ;;  %s1319_s6 = inlined_call_operand.vmem [shape: f32[32,1], index: 6, kind: input, shape index: {}]   ;;  %s1320_s7 = inlined_call_operand.vmem [shape: f32[3,32], index: 7, kind: input, shape index: {}]   ;;  %s1321_s8 = inlined_call_operand.vmem [shape: f32[2,6,256], index: 8, kind: output, shape index: {}]  }
   0x1 LB: > { %s978_s28 = sadd.s32 4294967295, %s1029_s27   ;;  %p982_p0 = scmp.ge.s32.totalorder %s1029_s27, 1  ;;  %s1029_s27 = sphi %s1082_s27, %s18_s27  }
   0x2   : > { %p272_p1 = scmp.lt.s32.totalorder %s1029_s27, 3 }
   0x4   : > { %p273_p2 = pnand %p982_p0, %p272_p1 }
   0x5   : > { %p311_p3 = scmp.lt.s32.totalorder (!%p273_p2), %s978_s28, 1  ;;  %s1031_s14 = smov (!%p273_p2), 112  }
   0x6   : > { %276 = sbr.rel (%p273_p2) target bundleno = 927 (0x39f), region = 52  ;;  %s1032_s15 = smov (!%p273_p2), 16  }
   0x7   : > { %s1033_s16 = smov (!%p273_p2), 1   ;;  %s1034_s17 = smov (!%p273_p2), 127  }
   0xb   : > { %s1331_s28 = smov (!%p311_p3, %s978_s28), 1  ;;  %vm386_vm0 = vcmask 1042432   ;;  %vm389_vm1 = vcmask 1045504   ;;  %vm392_vm2 = vcmask 1040384   ;;  %v326_v20 = vlaneseq  ;;  %v538_v52 = vld [vmem:[%s1317_s4 + $0x18] sm:$0xff]  ;;  %v537_v53 = vld [vmem:[%s1317_s4 + $0x10] sm:$0xff] }
   0xc   : > { %s1002_s29 = sshll.u32 %s1331_s28, 3  ;;  %v1035_v51 = vmov 0.0   ;;  %v1036_v54 = vmov 0   ;;  %v535_v55 = vld [vmem:[%s1317_s4] sm:$0xff]  ;;  %v536_v56 = vld [vmem:[%s1317_s4 + $0x8] sm:$0xff]  ;;  %v691_v57 = vld [vmem:[%s1319_s6 + $0x18] sm:$0xff] }
   0xd   : > { %s315_s10 = scalar_lea.vmem %s1313_s0, %s1002_s29  ;;  %s320_s13 = scalar_lea.vmem %s1314_s1, %s1002_s29  ;;  %v1104_v21 = vand.u32 127, %v326_v20  ;;  %651 = vmatprep.mubr.f32.mxu0 %v1035_v51  ;;  %789 = vmatprep.mubr.f32.mxu1 %v1035_v51  ;;  %v690_v58 = vld [vmem:[%s1319_s6 + $0x10] sm:$0xff]  ;;  %v689_v59 = vld [vmem:[%s1319_s6 + $0x8] sm:$0xff]  ;;  %v688_v60 = vld [vmem:[%s1319_s6] sm:$0xff]  ;;  %v498_v63 = vshrl.u32 %v326_v20, 7  ;;  %vm563_vm13 = vcmask 1041408  }
   0xe   : > { %v361_v0 = vld [vmem:[%s315_s10] sm:$0x77]  ;;  %1019 = vset.pattern.permute.xlu0 %v1036_v54  ;;  %1020 = vset.pattern.permute.xlu1 %v1036_v54  ;;  %vm570_vm14 = vcmask 48128   ;;  %vm712_vm15 = vcmask 261120  }
   0xf   : > { %v362_v1 = vld [vmem:[%s320_s13] sm:$0x77]  ;;  %v370_v3 = vrot.slane %v361_v0, 5  ;;  %v369_v5 = vcombine.high %v361_v0, %v361_v0  ;;  %v364_v6 = vmul.f32 %v361_v0, %v361_v0  ;;  %v1107_v22 = vadd.s32 128, %v1104_v21 }
  0x10   : > { %v363_v2 = vmul.f32 %v362_v1, %v361_v0  ;;  %v366_v4 = vcombine.high %v362_v1, %v362_v1  ;;  %vm428_vm3 = vcmp.lt.s32.totalorder %v1104_v21, 112  ;;  %vm403_vm4 = vcmp.lt.s32.totalorder %v1104_v21, 16 }
  0x11   : > { %v387_v8 = vsel %vm386_vm0, %v362_v1, %v370_v3  ;;  %v371_v9 = vrot.slane %v369_v5, 5  ;;  %v381_v11 = vcombine.high %v364_v6, %v364_v6  ;;  %v382_v17 = vrot.slane %v364_v6, 7  ;;  %v532_v1 = vld [vmem:[%s1316_s3 + $0x8] sm:$0xff] }
  0x12   : > { %v376_v7 = vrot.slane %v363_v2, 2  ;;  %v375_v10 = vcombine.high %v363_v2, %v363_v2  ;;  %vm360_vm5 = vcmp.lt.s32.totalorder %v1107_v22, 240  ;;  %vm357_vm6 = vcmp.ge.s32.totalorder %v1104_v21, 16  ;;  %v533_v2 = vld [vmem:[%s1316_s3 + $0x10] sm:$0xff] }
  0x13   : > { %v388_v14 = vsel %vm386_vm0, %v366_v4, %v371_v9  ;;  %v383_v16 = vrot.slane %v381_v11, 7  ;;  %v333_v61 = vand.u32 15, %v1104_v21  ;;  %v340_v62 = vand.u32 15, %v1107_v22 }
  0x14   : > { %v390_v12 = vsel %vm389_vm1, %v387_v8, %v376_v7  ;;  %v377_v13 = vrot.slane %v375_v10, 2  ;;  %v393_v19 = vsel %vm392_vm2, %v376_v7, %v382_v17  ;;  %vm453_vm7 = vcmp.lt.s32.totalorder %v1104_v21, 1  ;;  %v495_v8 = vld [vmem:[%s1315_s2] sm:$0x3] }
  0x15   : > { %420 = vrot.lane.b32.xlu1 %v390_v12, %s1031_s14  ;;  %395 = vrot.lane.b32.xlu0 %v390_v12, %s1032_s15  ;;  %vm1183_vm8 = vcmp.ge.s32.totalorder %v333_v61, 1  ;;  %vm1187_vm9 = vcmp.ge.s32.totalorder %v340_v62, 1  ;;  %v499_v4 = vsub.s32 0, %v498_v63  ;;  %v503_v5 = vsub.s32 1, %v498_v63 }
  0x16   : > { %v391_v15 = vsel %vm389_vm1, %v388_v14, %v377_v13  ;;  %v394_v18 = vsel %vm392_vm2, %v377_v13, %v383_v16  ;;  %vm478_vm10 = vcmp.lt.s32.totalorder %v1104_v21, 127  ;;  %vm1203_vm11 = vcmp.lt.s32.totalorder %v333_v61, 15 }
  0x17   : > { %vm1207_vm12 = vcmp.lt.s32.totalorder %v340_v62, 15  ;;  %v500_v14 = vrot.slane %v495_v8, %v499_v4 }
  0x19   : > { %424 = vrot.lane.b32.xlu1 %v391_v15, %s1031_s14  ;;  %399 = vrot.lane.b32.xlu0 %v391_v15, %s1032_s15 }
  0x1d   : > { %401 = vrot.lane.b32.xlu1 %v394_v18, %s1032_s15  ;;  %397 = vrot.lane.b32.xlu0 %v393_v19, %s1032_s15 }
  0x21   : > { %426 = vrot.lane.b32.xlu1 %v394_v18, %s1031_s14  ;;  %422 = vrot.lane.b32.xlu0 %v393_v19, %s1031_s14  ;;  %s1004_s14 = sshll.u32 %s1331_s28, 4 }
  0x87   : > { %v421_v23 = vpop.permute.xlu1 %420  ;;  %v396_v24 = vpop.permute.xlu0 %395 }
  0x8b   : > { %v425_v25 = vpop.permute.xlu1 %424  ;;  %v400_v26 = vpop.permute.xlu0 %399 }
  0x8c   : > { %v431_v27 = vsel %vm428_vm3, %v425_v25, %v421_v23  ;;  %v404_v28 = vsel %vm403_vm4, %v396_v24, %v400_v26  ;;  %v406_v29 = vsel %vm403_vm4, %v400_v26, %v396_v24  ;;  %v429_v34 = vsel %vm428_vm3, %v421_v23, %v425_v25 }
  0x8d   : > { %v438_v30 = vsel %vm360_vm5, %v431_v27, 0.0  ;;  %v412_v31 = vsel %vm357_vm6, %v406_v29, 0.0  ;;  %v417_v32 = vadd.f32 %v404_v28, %v391_v15  ;;  %v504_v15 = vrot.slane %v495_v8, %v503_v5 }
  0x8e   : > { %v416_v33 = vadd.f32 %v412_v31, %v390_v12 }
  0x8f   : > { %v402_v35 = vpop.permute.xlu1 %401  ;;  %v398_v36 = vpop.permute.xlu0 %397  ;;  %v1125_v37 = vadd.f32 %v438_v30, %v417_v32 }
  0x90   : > { %v405_v38 = vsel %vm403_vm4, %v398_v36, %v402_v35  ;;  %v407_v39 = vsel %vm403_vm4, %v402_v35, %v398_v36  ;;  %v1131_v40 = vadd.f32 %v429_v34, %v416_v33 }
  0x91   : > { %v414_v41 = vsel %vm357_vm6, %v407_v39, 0.0  ;;  %449 = vrot.lane.b32.xlu1 %v1125_v37, %s1033_s16  ;;  %v419_v42 = vadd.f32 %v405_v38, %v394_v18 }
  0x92   : > { %445 = vrot.lane.b32.xlu0 %v1131_v40, %s1033_s16  ;;  %v418_v45 = vadd.f32 %v414_v41, %v393_v19 }
  0x93   : > { %v427_v43 = vpop.permute.xlu1 %426  ;;  %v423_v44 = vpop.permute.xlu0 %422 }
  0x94   : > { %v432_v46 = vsel %vm428_vm3, %v427_v43, %v423_v44  ;;  %v430_v47 = vsel %vm428_vm3, %v423_v44, %v427_v43 }
  0x95   : > { %v440_v48 = vsel %vm360_vm5, %v432_v46, 0.0  ;;  %474 = vrot.lane.b32.xlu1 %v1125_v37, %s1034_s17  ;;  %v1147_v50 = vadd.f32 %v430_v47, %v418_v45 }
  0x96   : > { %v1144_v49 = vadd.f32 %v440_v48, %v419_v42  ;;  %470 = vrot.lane.b32.xlu0 %v1131_v40, %s1034_s17 }
  0x99   : > { %451 = vrot.lane.b32.xlu1 %v1144_v49, %s1033_s16 }
  0x9a   : > { %447 = vrot.lane.b32.xlu0 %v1147_v50, %s1033_s16 }
  0x9d   : > { %476 = vrot.lane.b32.xlu1 %v1144_v49, %s1034_s17 }
  0x9e   : > { %472 = vrot.lane.b32.xlu0 %v1147_v50, %s1034_s17  ;;  %s325_s17 = scalar_lea.vmem %s1321_s8, %s1004_s14 }
  0xa1   : > { %551 = vperm.xlu1 %1020, %v537_v53  }
  0xa2   : > { %556 = vperm.xlu0 %1019, %v538_v52  }
  0xa5   : > { %546 = vperm.xlu1 %1020, %v536_v56  }
  0xa6   : > { %541 = vperm.xlu0 %1019, %v535_v55  }
  0xa9   : > { %709 = vperm.xlu1 %1020, %v691_v57  }
  0xaa   : > { %704 = vperm.xlu0 %1019, %v690_v58  }
  0xad   : > { %699 = vperm.xlu1 %1020, %v689_v59  }
  0xae   : > { %694 = vperm.xlu0 %1019, %v688_v60  }
 0x103   : > { %v450_v0 = vpop.permute.xlu1 %449 }
 0x104   : > { %v446_v3 = vpop.permute.xlu0 %445 }
 0x105   : > { %v454_v6 = vsel %vm453_vm7, %v446_v3, %v450_v0  ;;  %v456_v7 = vsel %vm453_vm7, %v450_v0, %v446_v3  ;;  %v531_v0 = vld [vmem:[%s1316_s3] sm:$0xff]  ;;  %v534_v3 = vld [vmem:[%s1316_s3 + $0x18] sm:$0xff] }
 0x106   : > { %v462_v9 = vsel %vm1183_vm8, %v456_v7, 0.0  ;;  %v463_v10 = vsel %vm1187_vm9, %v454_v6, 0.0 }
 0x107   : > { %v475_v11 = vpop.permute.xlu1 %474  ;;  %v466_v17 = vadd.f32 %v462_v9, %v1131_v40  ;;  %v467_v18 = vadd.f32 %v463_v10, %v1125_v37 }
 0x108   : > { %v471_v16 = vpop.permute.xlu0 %470 }
 0x109   : > { %v479_v19 = vsel %vm478_vm10, %v471_v16, %v475_v11  ;;  %v481_v20 = vsel %vm478_vm10, %v475_v11, %v471_v16 }
 0x10a   : > { %v487_v22 = vsel %vm1203_vm11, %v479_v19, 0.0  ;;  %v488_v23 = vsel %vm1207_vm12, %v481_v20, 0.0 }
 0x10b   : > { %v491_v24 = vadd.f32 %v487_v22, %v466_v17  ;;  %v492_v25 = vadd.f32 %v488_v23, %v467_v18  ;;  %v452_v26 = vpop.permute.xlu1 %451 }
 0x10c   : > { %v448_v27 = vpop.permute.xlu0 %447 }
 0x10d   : > { %v1221_v28 = vmul.f32 %v500_v14, %v491_v24  ;;  %v1223_v29 = vmul.f32 %v504_v15, %v492_v25  ;;  %v455_v30 = vsel %vm453_vm7, %v448_v27, %v452_v26  ;;  %v457_v31 = vsel %vm453_vm7, %v452_v26, %v448_v27 }
 0x10e   : > { %v464_v32 = vsel %vm1183_vm8, %v457_v31, 0.0  ;;  %v465_v33 = vsel %vm1187_vm9, %v455_v30, 0.0 }
 0x10f   : > { %v477_v34 = vpop.permute.xlu1 %476  ;;  %v514_v35 = vrot.slane %v1223_v29, 3  ;;  %v513_v36 = vrot.slane %v1221_v28, 3  ;;  %v468_v37 = vadd.f32 %v464_v32, %v1147_v50  ;;  %v469_v38 = vadd.f32 %v465_v33, %v1144_v49 }
 0x110   : > { %v473_v39 = vpop.permute.xlu0 %472 }
 0x111   : > { %v480_v40 = vsel %vm478_vm10, %v473_v39, %v477_v34  ;;  %v482_v41 = vsel %vm478_vm10, %v477_v34, %v473_v39  ;;  %v518_v42 = vsel %vm386_vm0, %v514_v35, %v1223_v29  ;;  %v517_v43 = vsel %vm386_vm0, %v513_v36, %v1221_v28  ;;  %v686_v39 = vld [vmem:[%s1318_s5 + $0x10] sm:$0xff] }
 0x112   : > { %v489_v44 = vsel %vm1203_vm11, %v480_v40, 0.0  ;;  %v490_v45 = vsel %vm1207_vm12, %v482_v41, 0.0  ;;  %v520_v46 = vmul.f32 %v518_v42, %v1223_v29  ;;  %v519_v21 = vmul.f32 %v517_v43, %v1221_v28  ;;  %v687_v40 = vld [vmem:[%s1318_s5 + $0x18] sm:$0xff] }
 0x113   : > { %v493_v47 = vadd.f32 %v489_v44, %v468_v37  ;;  %v494_v48 = vadd.f32 %v490_v45, %v469_v38  ;;  %v684_v37 = vld [vmem:[%s1318_s5] sm:$0xff]  ;;  %v685_v38 = vld [vmem:[%s1318_s5 + $0x8] sm:$0xff] }
 0x114   : > { %v524_v49 = vrot.slane %v520_v46, 2  ;;  %v523_v50 = vrot.slane %v519_v21, 2 }
 0x115   : > { %v509_v52 = vmul.f32 %v500_v14, %v493_v47  ;;  %v510_v53 = vmul.f32 %v504_v15, %v494_v48 }
 0x116   : > { %v528_v54 = vsub.f32 %v1223_v29, %v524_v49  ;;  %v527_v55 = vsub.f32 %v1221_v28, %v523_v50 }
 0x117   : > { %v530_v56 = vsub.f32 %v510_v53, %v524_v49  ;;  %v529_v57 = vsub.f32 %v509_v52, %v523_v50 }
 0x118   : > { %v567_v58 = vrot.slane %v528_v54, 6  ;;  %v564_v59 = vrot.slane %v527_v55, 6 }
 0x119   : > { %v568_v60 = vrot.slane %v530_v56, 6  ;;  %v565_v61 = vrot.slane %v529_v57, 6 }
 0x11b   : > { %v569_v62 = vsel %vm563_vm13, %v567_v58, %v568_v60  ;;  %v566_v63 = vsel %vm563_vm13, %v564_v59, %v565_v61 }
 0x11c   : > { %989 = vmatprep.subr.msk.mxu0 %vm389_vm1, %v569_v62  ;;  %v552_v9 = vpop.permute.xlu1 %551 }
 0x11d   : > { %990 = vmatpush1.msk.msra.mxu0 %vm389_vm1, %v566_v63  ;;  %v557_v11 = vpop.permute.xlu0 %556 }
 0x11e   : > { %991 = vmatmul.mubr.msk.f32.vlgmr.msra.gmra.mxu0 %vm570_vm14, %v531_v0 }
 0x11f   : > { %657 = vmatprep.mubr.f32.mxu0 %v1035_v51 }
 0x120   : > { %v547_v15 = vpop.permute.xlu1 %546 }
 0x121   : > { %v542_v19 = vpop.permute.xlu0 %541 }
 0x122   : > { %992 = vmatmul.mubr.msk.f32.gmra.mxu0 %vm570_vm14, %v532_v1 }
 0x123   : > { %663 = vmatprep.mubr.f32.mxu0 %v1035_v51 }
 0x124   : > { %v710_v46 = vpop.permute.xlu1 %709 }
 0x125   : > { %v705_v47 = vpop.permute.xlu0 %704 }
 0x126   : > { %993 = vmatmul.mubr.msk.f32.gmra.mxu0 %vm570_vm14, %v533_v2 }
 0x127   : > { %669 = vmatprep.mubr.f32.mxu0 %v1035_v51 }
 0x129   : > { %v695_v57 = vpop.permute.xlu0 %694 }
 0x12a   : > { %994 = vmatmul.mubr.msk.f32.gmra.mxu0 %vm570_vm14, %v534_v3 }
 0x12b   : > { %890 = vmatprep.mubr.f32.mxu0 %v1035_v51 }
 0x1de   : > { %v653_v4 = vpop.f32.mrf.mxu0 }
 0x1df   : > { %v654_v27 = vadd.f32 %v653_v4, %v542_v19  ;;  %v822_v4 = vld [vmem:[%s1320_s7] sm:$0x7] }
 0x1e0   : > { %v655_v5 = vpop.f32.mrf.mxu0 }
 0x1e1   : > { %v656_v25 = vadd.f32 %v655_v5, %v542_v19  ;;  %v676_v34 = vmax.f32 %v654_v27, 0.0 }
 0x1e2   : > { %v659_v6 = vpop.f32.mrf.mxu0 }
 0x1e3   : > { %v660_v23 = vadd.f32 %v659_v6, %v547_v15  ;;  %v677_v33 = vmax.f32 %v656_v25, 0.0 }
 0x1e4   : > { %v661_v7 = vpop.f32.mrf.mxu0 }
 0x1e5   : > { %v662_v20 = vadd.f32 %v661_v7, %v547_v15  ;;  %v678_v32 = vmax.f32 %v660_v23, 0.0 }
 0x1e6   : > { %v665_v8 = vpop.f32.mrf.mxu0 }
 0x1e7   : > { %v666_v18 = vadd.f32 %v665_v8, %v552_v9  ;;  %v679_v31 = vmax.f32 %v662_v20, 0.0 }
 0x1e8   : > { %v667_v10 = vpop.f32.mrf.mxu0 }
 0x1e9   : > { %v668_v16 = vadd.f32 %v667_v10, %v552_v9  ;;  %v680_v30 = vmax.f32 %v666_v18, 0.0 }
 0x1ea   : > { %v671_v12 = vpop.f32.mrf.mxu0 }
 0x1eb   : > { %v672_v13 = vadd.f32 %v671_v12, %v557_v11  ;;  %v681_v26 = vmax.f32 %v668_v16, 0.0 }
 0x1ec   : > { %v673_v14 = vpop.f32.mrf.mxu0 }
 0x1ed   : > { %v674_v17 = vadd.f32 %v673_v14, %v557_v11  ;;  %v682_v24 = vmax.f32 %v672_v13, 0.0 }
 0x1ef   : > { %v683_v22 = vmax.f32 %v674_v17, 0.0 }
 0x1f1   : > { %749 = vmatprep.subr.mxu1 %v683_v22 }
 0x1f2   : > { %750 = vmatpush1.msra.mxu1 %v682_v24 }
 0x1f3   : > { %751 = vmatprep.subr.mxu1 %v681_v26 }
 0x1f4   : > { %752 = vmatpush1.msra.mxu1 %v680_v30 }
 0x1f5   : > { %753 = vmatprep.subr.mxu1 %v679_v31 }
 0x1f6   : > { %754 = vmatpush1.msra.mxu1 %v678_v32 }
 0x1f7   : > { %755 = vmatprep.subr.mxu1 %v677_v33 }
 0x1f8   : > { %756 = vmatpush1.msra.mxu1 %v676_v34 }
 0x1f9   : > { %995 = vmatmul.mubr.msk.f32.vlgmr.msra.gmra.mxu1 %vm712_vm15, %v684_v37 }
 0x1fa   : > { %795 = vmatprep.mubr.f32.mxu1 %v1035_v51 }
 0x1fd   : > { %996 = vmatmul.mubr.msk.f32.gmra.mxu1 %vm712_vm15, %v685_v38 }
 0x1fe   : > { %801 = vmatprep.mubr.f32.mxu1 %v1035_v51 }
 0x201   : > { %997 = vmatmul.mubr.msk.f32.gmra.mxu1 %vm712_vm15, %v686_v39 }
 0x202   : > { %807 = vmatprep.mubr.f32.mxu1 %v1035_v51  ;;  %v700_v51 = vpop.permute.xlu1 %699 }
 0x205   : > { %998 = vmatmul.mubr.msk.f32.gmra.mxu1 %vm712_vm15, %v687_v40 }
 0x2b9   : > { %v791_v41 = vpop.f32.mrf.mxu1 }
 0x2ba   : > { %v792_v62 = vadd.f32 %v791_v41, %v695_v57 }
 0x2bb   : > { %v793_v42 = vpop.f32.mrf.mxu1 }
 0x2bc   : > { %v794_v60 = vadd.f32 %v793_v42, %v695_v57  ;;  %v814_v3 = vmax.f32 %v792_v62, 0.0 }
 0x2bd   : > { %v797_v43 = vpop.f32.mrf.mxu1 }
 0x2be   : > { %v798_v58 = vadd.f32 %v797_v43, %v700_v51  ;;  %v815_v2 = vmax.f32 %v794_v60, 0.0 }
 0x2bf   : > { %v799_v44 = vpop.f32.mrf.mxu1 }
 0x2c0   : > { %v800_v55 = vadd.f32 %v799_v44, %v700_v51  ;;  %v816_v1 = vmax.f32 %v798_v58, 0.0 }
 0x2c1   : > { %v803_v45 = vpop.f32.mrf.mxu1 }
 0x2c2   : > { %v804_v54 = vadd.f32 %v803_v45, %v705_v47  ;;  %v817_v0 = vmax.f32 %v800_v55, 0.0 }
 0x2c3   : > { %v805_v21 = vpop.f32.mrf.mxu1 }
 0x2c4   : > { %v806_v52 = vadd.f32 %v805_v21, %v705_v47  ;;  %v818_v63 = vmax.f32 %v804_v54, 0.0 }
 0x2c5   : > { %v809_v48 = vpop.f32.mrf.mxu1 }
 0x2c6   : > { %v810_v49 = vadd.f32 %v809_v48, %v710_v46  ;;  %v819_v61 = vmax.f32 %v806_v52, 0.0 }
 0x2c7   : > { %v811_v50 = vpop.f32.mrf.mxu1 }
 0x2c8   : > { %v812_v53 = vadd.f32 %v811_v50, %v710_v46  ;;  %v820_v59 = vmax.f32 %v810_v49, 0.0 }
 0x2ca   : > { %v821_v56 = vmax.f32 %v812_v53, 0.0 }
 0x2cc   : > { %850 = vmatprep.subr.mxu0 %v821_v56 }
 0x2cd   : > { %851 = vmatpush1.msra.mxu0 %v820_v59 }
 0x2ce   : > { %852 = vmatprep.subr.mxu0 %v819_v61 }
 0x2cf   : > { %853 = vmatpush1.msra.mxu0 %v818_v63 }
 0x2d0   : > { %854 = vmatprep.subr.mxu0 %v817_v0 }
 0x2d1   : > { %855 = vmatpush1.msra.mxu0 %v816_v1 }
 0x2d2   : > { %856 = vmatprep.subr.mxu0 %v815_v2 }
 0x2d3   : > { %857 = vmatpush1.msra.mxu0 %v814_v3 }
 0x2d4   : > { %999 = vmatmul.mubr.msk.f32.vlgmr.msra.gmra.mxu0 %vm712_vm15, %v822_v4 }
 0x394   : > { %v892_v5 = vpop.f32.mrf.mxu0 }
 0x395   : > { %v897_v6 = vmul.f32 %v892_v5, %v513_v36 }
 0x396   : > { %v894_v7 = vpop.f32.mrf.mxu0 }
 0x397   : > { %v899_v8 = vsub.f32 %v1221_v28, %v897_v6  ;;  %v898_v9 = vmul.f32 %v894_v7, %v514_v35 }
 0x399   : > { %v903_v10 = vrot.slane %v899_v8, 5  ;;  %v900_v11 = vsub.f32 %v1223_v29, %v898_v9 }
 0x39b   : > { %v907_v12 = vsel %vm386_vm0, %v892_v5, %v903_v10  ;;  %v904_v13 = vrot.slane %v900_v11, 5 }
 0x39c   : > { %909 = vst [vmem:[%s325_s17] sm:$0x3f] %v907_v12 }
 0x39d   : > { %v908_v36 = vsel %vm386_vm0, %v894_v7, %v904_v13 }
 0x39e   : > { %910 = vst [vmem:[%s325_s17 + $0x8] sm:$0x3f] %v908_v36 }
 0x39f PF: > { %s18_s27 = sadd.s32 1, %s1029_s27  }
 0x3a0   : > { %p15_p4 = scmp.ge.s32.totalorder %s18_s27, 4  }
 0x3a2   :  { %17 = sbr.rel (!%p15_p4) target bundleno = 1 (0x1), region = 85 }

// kernel: conv_guided_filter.3
= control target key start
LH: loop header
LB: loop body
LE: loop exit
PB: predicated region body
PF: predicated region fallthrough
CT: control target
= control target key end

     0   :  { %9 = vsyncpa [#allocation4], 0  ;;  %s1528_s0 = inlined_call_operand.vmem [shape: f32[2,6,16,16], index: 0, kind: input, shape index: {}]   ;;  %s1529_s1 = inlined_call_operand.vmem [shape: bf16[32,16], index: 1, kind: input, shape index: {}]   ;;  %s1530_s2 = inlined_call_operand.vmem [shape: bf16[16,32], index: 2, kind: input, shape index: {}]   ;;  %s1531_s3 = inlined_call_operand.vmem [shape: f32[2,3,32,32], index: 3, kind: input, shape index: {}]   ;;  %s1532_s4 = inlined_call_operand.hbm [shape: f32[2,3,32,32], index: 4, kind: output, shape index: {}]  }
   0x1   :  { %11 = vsyncpa [#allocation4 + $0x1], 0  ;;  %s1312_s15 = smov 0   ;;  %s1314_s16 = smov 0  }
   0x2   :  { %s1316_s17 = smov 0   ;;  %s1318_s18 = smov 0  }
   0x3   :  { %s1320_s19 = smov 0   ;;  %s1322_s20 = smov 0  }
   0x4 LB: > { %s1000_s21 = sadd.s32 4294967295, %s1282_s20   ;;  %s1001_s22 = sadd.s32 4294967294, %s1282_s20   ;;  %s1282_s20 = sphi %s1322_s20, %s17_s20   ;;  %s1278_s19 = sphi %s1320_s19, %s1539_s19   ;;  %s1274_s18 = sphi %s1318_s18, %s1538_s18   ;;  %s1270_s17 = sphi %s1316_s17, %s1537_s17   ;;  %s1266_s16 = sphi %s1314_s16, %s1536_s16   ;;  %s1262_s15 = sphi %s1312_s15, %s1535_s15  }
   0x5   : > { %s29_s23 = sadd.s32 1, %s1278_s19  ;;  %s139_s24 = sadd.s32 1, %s1270_s17 }
   0x6   : > { %p31_p0 = scmp.ge.s32.totalorder %s29_s23, 2  ;;  %p149_p1 = scmp.ne.s32.totalorder %s1270_s17, %s1266_s16 }
   0x7   : > { %p150_p2 = scmp.eq.s32.totalorder %s1000_s21, 1  ;;  %p155_p3 = scmp.ne.s32.totalorder %s1266_s16, %s1262_s15 }
   0x8   : > { %s1541_s23 = smov (%p31_p0, %s29_s23), 0  ;;  %p156_p5 = scmp.eq.s32.totalorder %s1001_s22, 1 }
   0x9   : > { %p1352_p4 = por %p150_p2, %p149_p1  ;;  %s134_s26 = ssub.s32 %s1278_s19, %s1541_s23 }
   0xa   : > { %p1005_p6 = scmp.ge.s32.totalorder %s1282_s20, 1  ;;  %p137_p7 = scmp.eq.s32.totalorder %s134_s26, 0 }
   0xb   : > { %p1359_p8 = por %p156_p5, %p155_p3  ;;  %p207_p9 = scmp.lt.s32.totalorder %s1282_s20, 3 }
   0xc   : > { %s1365_s28 = scalar_select %p137_p7, %s1270_s17, %s139_s24  }
   0xd   : > { %p208_p10 = pnand %p1005_p6, %p207_p9 }
   0xe   : > { %p247_p11 = scmp.lt.s32.totalorder (!%p208_p10), %s1274_s18, 1  ;;  %s244_s24 = sand.u32 (!%p208_p10), 1, %s1266_s16  }
   0xf   : > { %211 = sbr.rel (%p208_p10) target bundleno = 483 (0x1e3), region = 36  ;;  %s1284_s10 = smov (!%p208_p10), [#allocation3]  }
  0x10   : > { %s1137_s26 = smul.u32 (!%p208_p10), 96, %s244_s24  ;;  %s1210_s11 = sshll.u32 (!%p208_p10), %s1284_s10, 4  ;;  %s1211_s11 = int_to_ptr.vmem [resolvable:$false] %s1210_s11 }
  0x11   : > { %s1139_s30 = smul.u32 (!%p208_p10), 1536, %s1274_s18  ;;  %s1212_s12 = scalar_lea.vmem (!%p208_p10), %s1211_s11, 3072 }
  0x12   : > { %s1438_s29 = scalar_lea.vmem (!%p208_p10), [#allocation3], %s1137_s26 }
  0x13   : > { %s1473_s8 = scalar_lea.hbm (!%p208_p10), %s1532_s4, %s1139_s30 }
  0x14   : > { %v1197_v0 = vld [vmem:[%s1530_s2] sm:$0xff]   ;;  %s1372_s5 = scalar_select %p247_p11, %s1274_s18, 1  ;;  %vm300_vm0 = vcmask 130048   ;;  %vm448_vm1 = vcmask 257024   ;;  %v1200_v40 = vld [vmem:[%s1529_s1 + $0x8] sm:$0xff]   ;;  %vm865_vm2 = vcmask 261120  }
  0x15   : > { %1087 = vmatprep.subr.bf16.mxu0 %v1197_v0  ;;  %v1389_v19 = vld [vmem:[%s1529_s1] sm:$0xff]   ;;  %s1483_s18 = scalar_lea.sflag [#allocation4], %s244_s24 }
  0x16   : > { %1088 = vmatpush3.bf16.msra.mxu0 %v1197_v0  ;;  %s1138_s6 = smul.u32 96, %s1372_s5  ;;  %1103 = vmatprep.mubr.msk.bf16.mxu1 %vm300_vm0, %v1389_v19  ;;  %s894_s5 = sshll.u32 %s1438_s29, 4  ;;  %s1477_s5 = int_to_ptr.vmem [resolvable:$true] %s894_s5 }
  0x17   : > { %p1213_p1 = scmp.lt.s32.totalorder %s1477_s5, %s1211_s11 }
  0x18   : > { %s251_s9 = scalar_lea.vmem %s1528_s0, %s1138_s6  ;;  %s1429_s22 = scalar_lea.vmem %s1531_s3, %s1138_s6 }
  0x19   : > { %v274_v1 = vld [vmem:[%s251_s9] sm:$0xff]  ;;  %v275_v2 = vld [vmem:[%s251_s9 + $0x8] sm:$0xff]  ;;  %v276_v3 = vld [vmem:[%s251_s9 + $0x10] sm:$0xff] }
  0x1a   : > { %v286_v4 = vpack.c.bf16 %v275_v2, %v274_v1  ;;  %v277_v5 = vld [vmem:[%s251_s9 + $0x18] sm:$0xff]  ;;  %v278_v6 = vld [vmem:[%s251_s9 + $0x20] sm:$0xff]  ;;  %v279_v7 = vld [vmem:[%s251_s9 + $0x28] sm:$0xff] }
  0x1b   : > { %v287_v8 = vpack.c.bf16 %v277_v5, %v276_v3  ;;  %v288_v9 = vpack.c.bf16 %v279_v7, %v278_v6  ;;  %v280_v10 = vld [vmem:[%s251_s9 + $0x30] sm:$0xff]  ;;  %v281_v11 = vld [vmem:[%s251_s9 + $0x38] sm:$0xff]  ;;  %v282_v12 = vld [vmem:[%s251_s9 + $0x40] sm:$0xff] }
  0x1c   : > { %1089 = vmatprep.mubr.msk.bf16.mxu0 %vm300_vm0, %v286_v4  ;;  %v283_v13 = vld [vmem:[%s251_s9 + $0x48] sm:$0xff]  ;;  %v289_v14 = vpack.c.bf16 %v281_v11, %v280_v10  ;;  %v284_v16 = vld [vmem:[%s251_s9 + $0x50] sm:$0xff]  ;;  %v285_v17 = vld [vmem:[%s251_s9 + $0x58] sm:$0xff]  ;;  %s1206_s9 = scalar_lea.vmem %s1477_s5, 1536 }
  0x1d   : > { %1090 = vmatmul.mubr.msk.bf16.vlgmr.msra.gmra.mxu0 %vm300_vm0, %v287_v8  ;;  %v290_v15 = vpack.c.bf16 %v283_v13, %v282_v12  ;;  %v291_v18 = vpack.c.bf16 %v285_v17, %v284_v16  ;;  %v467_v53 = vld [vmem:[%s1429_s22 + $0x10] sm:$0xff]  ;;  %v465_v55 = vld [vmem:[%s1429_s22] sm:$0xff]  ;;  %v468_v58 = vld [vmem:[%s1429_s22 + $0x18] sm:$0xff]  ;;  %p1207_p12 = scmp.ne.s32.totalorder %s1477_s5, %s1206_s9  ;;  %p1214_p2 = scmp.lt.s32.totalorder %s1212_s12, %s1206_s9 }
  0x1e   : > { %1093 = vmatprep.mubr.msk.bf16.mxu0 %vm300_vm0, %v288_v9  ;;  %v466_v62 = vld [vmem:[%s1429_s22 + $0x8] sm:$0xff]  ;;  %v471_v6 = vld [vmem:[%s1429_s22 + $0x30] sm:$0xff]  ;;  %v469_v9 = vld [vmem:[%s1429_s22 + $0x20] sm:$0xff] }
  0x1f   : > { %v472_v13 = vld [vmem:[%s1429_s22 + $0x38] sm:$0xff]  ;;  %p1208_p13 = pnand %p1207_p12, %p1352_p4  ;;  %p1215_p3 = por %p1214_p2, %p1213_p1 }
  0x21   : > { %p1209_p0 = pneg %p1208_p13 }
  0x23   : > { %p1216_p5 = pnand %p1215_p3, %p1209_p0 }
  0x25   : > { %1094 = vmatmul.mubr.msk.bf16.gmra.mxu0 %vm300_vm0, %v289_v14 }
  0x26   : > { %1097 = vmatprep.mubr.msk.bf16.mxu0 %vm300_vm0, %v290_v15 }
  0x2d   : > { %1098 = vmatmul.mubr.msk.bf16.gmra.mxu0 %vm300_vm0, %v291_v18  ;;  %v470_v18 = vld [vmem:[%s1429_s22 + $0x28] sm:$0xff] }
  0x2e   : > { %1121 = vmatprep.mubr.msk.bf16.mxu0 %vm300_vm0, %v1389_v19 }
  0xdd   : > { %v1091_v20 = vpop.f32.mrf.mxu0 }
  0xde   : > { %v1052_v21 = vpack.c.bf16 %v1091_v20, %v1091_v20 }
  0xdf   : > { %v353_v22 = vpop.f32.mrf.mxu0 }
  0xe0   : > { %451 = vst.msk [vmem:[#allocation2 + $0x8] sm:$0xf] %vm448_vm1, %v1052_v21  ;;  %v1050_v23 = vpack.c.bf16 %v353_v22, %v353_v22 }
  0xe1   : > { %v1092_v24 = vpop.f32.mrf.mxu0 }
  0xe2   : > { %449 = vst.msk [vmem:[#allocation2] sm:$0xf] %vm448_vm1, %v1050_v23  ;;  %v1053_v25 = vpack.c.bf16 %v1092_v24, %v1092_v24  ;;  %v475_v24 = vld [vmem:[%s1429_s22 + $0x50] sm:$0xff] }
  0xe3   : > { %v356_v26 = vpop.f32.mrf.mxu0 }
  0xe4   : > { %452 = vst.msk [vmem:[#allocation2 + $0xc] sm:$0xf] %vm448_vm1, %v1053_v25  ;;  %v1051_v27 = vpack.c.bf16 %v356_v26, %v356_v26 }
  0xe5   : > { %v1095_v28 = vpop.f32.mrf.mxu0 }
  0xe6   : > { %450 = vst.msk [vmem:[#allocation2 + $0x4] sm:$0xf] %vm448_vm1, %v1051_v27  ;;  %v1056_v29 = vpack.c.bf16 %v1095_v28, %v1095_v28  ;;  %v473_v28 = vld [vmem:[%s1429_s22 + $0x40] sm:$0xff] }
  0xe7   : > { %v369_v30 = vpop.f32.mrf.mxu0 }
  0xe8   : > { %455 = vst.msk [vmem:[#allocation2 + $0x18] sm:$0xf] %vm448_vm1, %v1056_v29  ;;  %v1054_v31 = vpack.c.bf16 %v369_v30, %v369_v30 }
  0xe9   : > { %v1096_v32 = vpop.f32.mrf.mxu0 }
  0xea   : > { %453 = vst.msk [vmem:[#allocation2 + $0x10] sm:$0xf] %vm448_vm1, %v1054_v31  ;;  %v1057_v33 = vpack.c.bf16 %v1096_v32, %v1096_v32 }
  0xeb   : > { %v372_v34 = vpop.f32.mrf.mxu0  ;;  %v1202_v47 = vld [vmem:[#allocation2 + $0x8] sm:$0xff]  }
  0xec   : > { %456 = vst.msk [vmem:[#allocation2 + $0x1c] sm:$0xf] %vm448_vm1, %v1057_v33  ;;  %v1055_v35 = vpack.c.bf16 %v372_v34, %v372_v34  ;;  %v476_v33 = vld [vmem:[%s1429_s22 + $0x58] sm:$0xff] }
  0xed   : > { %v1099_v36 = vpop.f32.mrf.mxu0  ;;  %v1198_v37 = vld [vmem:[#allocation2] sm:$0xff]  }
  0xee   : > { %454 = vst.msk [vmem:[#allocation2 + $0x14] sm:$0xf] %vm448_vm1, %v1055_v35  ;;  %v1060_v38 = vpack.c.bf16 %v1099_v36, %v1099_v36  ;;  %1101 = vmatprep.subr.bf16.mxu1 %v1198_v37 }
  0xef   : > { %v385_v39 = vpop.f32.mrf.mxu0  ;;  %1102 = vmatpush3.bf16.msra.mxu1 %v1198_v37 }
  0xf0   : > { %459 = vst.msk [vmem:[#allocation2 + $0x28] sm:$0xf] %vm448_vm1, %v1060_v38  ;;  %v1058_v41 = vpack.c.bf16 %v385_v39, %v385_v39  ;;  %v474_v38 = vld [vmem:[%s1429_s22 + $0x48] sm:$0xff] }
  0xf1   : > { %v1100_v42 = vpop.f32.mrf.mxu0 }
  0xf2   : > { %457 = vst.msk [vmem:[#allocation2 + $0x20] sm:$0xf] %vm448_vm1, %v1058_v41  ;;  %v1061_v43 = vpack.c.bf16 %v1100_v42, %v1100_v42  ;;  %1104 = vmatmul.mubr.msk.bf16.vlgmr.msra.gmra.mxu1 %vm300_vm0, %v1200_v40 }
  0xf3   : > { %v388_v44 = vpop.f32.mrf.mxu0  ;;  %v1201_v45 = vld [vmem:[#allocation2 + $0x18] sm:$0xff]   ;;  %1109 = vmatprep.mubr.msk.bf16.mxu1 %vm300_vm0, %v1389_v19 }
  0xf4   : > { %460 = vst.msk [vmem:[#allocation2 + $0x2c] sm:$0xf] %vm448_vm1, %v1061_v43  ;;  %v1059_v46 = vpack.c.bf16 %v388_v44, %v388_v44  ;;  %1107 = vmatprep.subr.bf16.mxu1 %v1201_v45 }
  0xf5   : > { %1108 = vmatpush3.bf16.msra.mxu1 %v1201_v45  ;;  %v1203_v48 = vld [vmem:[#allocation2 + $0x10] sm:$0xff]  }
  0xf6   : > { %458 = vst.msk [vmem:[#allocation2 + $0x24] sm:$0xf] %vm448_vm1, %v1059_v46  ;;  %1113 = vmatprep.subr.bf16.mxu1 %v1202_v47 }
  0xfa   : > { %1110 = vmatmul.mubr.msk.bf16.vlgmr.msra.gmra.mxu1 %vm300_vm0, %v1200_v40 }
  0xfb   : > { %1114 = vmatpush3.bf16.msra.mxu1 %v1202_v47  ;;  %1115 = vmatprep.mubr.msk.bf16.mxu1 %vm300_vm0, %v1389_v19  ;;  %v1205_v50 = vld [vmem:[#allocation2 + $0x28] sm:$0xff]  }
  0xfc   : > { %1125 = vmatprep.subr.bf16.mxu1 %v1203_v48 }
  0xfd   : > { %v1204_v49 = vld [vmem:[#allocation2 + $0x20] sm:$0xff]  }
  0xfe   : > { %1119 = vmatprep.subr.bf16.mxu0 %v1204_v49 }
  0xff   : > { %1120 = vmatpush3.bf16.msra.mxu0 %v1204_v49 }
 0x100   : > { %1131 = vmatprep.subr.bf16.mxu0 %v1205_v50 }
 0x102   : > { %1116 = vmatmul.mubr.msk.bf16.vlgmr.msra.gmra.mxu1 %vm300_vm0, %v1200_v40  ;;  %1122 = vmatmul.mubr.msk.bf16.vlgmr.msra.gmra.mxu0 %vm300_vm0, %v1200_v40 }
 0x103   : > { %1126 = vmatpush3.bf16.msra.mxu1 %v1203_v48  ;;  %1132 = vmatpush3.bf16.msra.mxu0 %v1205_v50 }
 0x104   : > { %1127 = vmatprep.mubr.msk.bf16.mxu1 %vm300_vm0, %v1389_v19  ;;  %1133 = vmatprep.mubr.msk.bf16.mxu0 %vm300_vm0, %v1389_v19 }
 0x10a   : > { %1128 = vmatmul.mubr.msk.bf16.vlgmr.msra.gmra.mxu1 %vm300_vm0, %v1200_v40  ;;  %1134 = vmatmul.mubr.msk.bf16.vlgmr.msra.gmra.mxu0 %vm300_vm0, %v1200_v40 }
 0x1b2   : > { %v1105_v51 = vpop.f32.mrf.mxu1 }
 0x1b3   : > { %v611_v57 = vmul.f32 %v1105_v51, %v467_v53 }
 0x1b4   : > { %v536_v52 = vpop.f32.mrf.mxu1 }
 0x1b5   : > { %v609_v60 = vmul.f32 %v536_v52, %v465_v55 }
 0x1b6   : > { %v1106_v54 = vpop.f32.mrf.mxu1 }
 0x1b7   : > { %v612_v0 = vmul.f32 %v1106_v54, %v468_v58 }
 0x1b8   : > { %v539_v56 = vpop.f32.mrf.mxu1 }
 0x1b9   : > { %v610_v3 = vmul.f32 %v539_v56, %v466_v62 }
 0x1ba   : > { %v1111_v59 = vpop.f32.mrf.mxu1 }
 0x1bb   : > { %v615_v61 = vadd.f32 %v1111_v59, %v611_v57 }
 0x1bc   : > { %v594_v63 = vpop.f32.mrf.mxu1 }
 0x1bd   : > { %868 = vst.msk [vmem:[%s1438_s29 + $0x10] sm:$0xff] %vm865_vm2, %v615_v61  ;;  %v613_v1 = vadd.f32 %v609_v60, %v594_v63 }
 0x1be   : > { %v1112_v2 = vpop.f32.mrf.mxu1 }
 0x1bf   : > { %866 = vst.msk [vmem:[%s1438_s29] sm:$0xff] %vm865_vm2, %v613_v1  ;;  %v616_v4 = vadd.f32 %v1112_v2, %v612_v0 }
 0x1c0   : > { %v597_v5 = vpop.f32.mrf.mxu1 }
 0x1c1   : > { %869 = vst.msk [vmem:[%s1438_s29 + $0x18] sm:$0xff] %vm865_vm2, %v616_v4  ;;  %v614_v7 = vadd.f32 %v610_v3, %v597_v5 }
 0x1c2   : > { %v1117_v8 = vpop.f32.mrf.mxu1  ;;  %v1123_v10 = vpop.f32.mrf.mxu0 }
 0x1c3   : > { %867 = vst.msk [vmem:[%s1438_s29 + $0x8] sm:$0xff] %vm865_vm2, %v614_v7  ;;  %v735_v11 = vmul.f32 %v1117_v8, %v471_v6 }
 0x1c4   : > { %v660_v12 = vpop.f32.mrf.mxu1  ;;  %v718_v14 = vpop.f32.mrf.mxu0 }
 0x1c5   : > { %v733_v15 = vmul.f32 %v660_v12, %v469_v9  ;;  %v739_v16 = vadd.f32 %v1123_v10, %v735_v11 }
 0x1c6   : > { %v1118_v17 = vpop.f32.mrf.mxu1  ;;  %v1124_v19 = vpop.f32.mrf.mxu0 }
 0x1c7   : > { %872 = vst.msk [vmem:[%s1438_s29 + $0x30] sm:$0xff] %vm865_vm2, %v739_v16  ;;  %v736_v20 = vmul.f32 %v1118_v17, %v472_v13  ;;  %v737_v21 = vadd.f32 %v733_v15, %v718_v14 }
 0x1c8   : > { %v663_v22 = vpop.f32.mrf.mxu1  ;;  %v721_v23 = vpop.f32.mrf.mxu0 }
 0x1c9   : > { %870 = vst.msk [vmem:[%s1438_s29 + $0x20] sm:$0xff] %vm865_vm2, %v737_v21  ;;  %v734_v25 = vmul.f32 %v663_v22, %v470_v18  ;;  %v740_v26 = vadd.f32 %v1124_v19, %v736_v20 }
 0x1ca   : > { %v1129_v27 = vpop.f32.mrf.mxu1  ;;  %v1135_v29 = vpop.f32.mrf.mxu0 }
 0x1cb   : > { %873 = vst.msk [vmem:[%s1438_s29 + $0x38] sm:$0xff] %vm865_vm2, %v740_v26  ;;  %v738_v30 = vadd.f32 %v734_v25, %v721_v23  ;;  %v859_v31 = vmul.f32 %v1129_v27, %v475_v24 }
 0x1cc   : > { %v784_v32 = vpop.f32.mrf.mxu1  ;;  %v842_v34 = vpop.f32.mrf.mxu0 }
 0x1cd   : > { %871 = vst.msk [vmem:[%s1438_s29 + $0x28] sm:$0xff] %vm865_vm2, %v738_v30  ;;  %v857_v35 = vmul.f32 %v784_v32, %v473_v28  ;;  %v863_v36 = vadd.f32 %v1135_v29, %v859_v31 }
 0x1ce   : > { %v1130_v37 = vpop.f32.mrf.mxu1  ;;  %v1136_v39 = vpop.f32.mrf.mxu0 }
 0x1cf   : > { %876 = vst.msk [vmem:[%s1438_s29 + $0x50] sm:$0xff] %vm865_vm2, %v863_v36  ;;  %v860_v40 = vmul.f32 %v1130_v37, %v476_v33  ;;  %v861_v41 = vadd.f32 %v857_v35, %v842_v34 }
 0x1d0   : > { %v787_v42 = vpop.f32.mrf.mxu1  ;;  %v845_v45 = vpop.f32.mrf.mxu0 }
 0x1d1   : > { %874 = vst.msk [vmem:[%s1438_s29 + $0x40] sm:$0xff] %vm865_vm2, %v861_v41  ;;  %v858_v43 = vmul.f32 %v787_v42, %v474_v38  ;;  %v864_v44 = vadd.f32 %v1136_v39, %v860_v40 }
 0x1d3   : > { %877 = vst.msk [vmem:[%s1438_s29 + $0x58] sm:$0xff] %vm865_vm2, %v864_v44  ;;  %v862_v46 = vadd.f32 %v858_v43, %v845_v45 }
 0x1d5   : > { %875 = vst.msk [vmem:[%s1438_s29 + $0x48] sm:$0xff] %vm865_vm2, %v862_v46 }
 0x1d6   : > { %1219 = shalt.err (!%p1216_p5)
}
 0x1d7   : > { %s1220_s13 = scalar_lea.hbm %s1473_s8, 1536  ;;  %s1224_s22 = scalar_lea.hbm %s1532_s4, 3072 }
 0x1d8   : > { %p1221_p6 = scmp.ne.s32.totalorder %s1473_s8, %s1220_s13  ;;  %p1225_p10 = scmp.lt.s32.totalorder %s1473_s8, %s1532_s4 }
 0x1d9   : > { %p1226_p11 = scmp.lt.s32.totalorder %s1224_s22, %s1220_s13 }
 0x1da   : > { %p1222_p7 = pnand %p1221_p6, %p1352_p4 }
 0x1db   : > { %p1227_p12 = por %p1226_p11, %p1225_p10 }
 0x1dc   : > { %p1223_p9 = pneg %p1222_p7 }
 0x1de   : > { %p1228_p13 = pnand %p1227_p12, %p1223_p9 }
 0x1e0   : > { %1231 = shalt.err (!%p1228_p13)
}
 0x1e1   : > { %s1285_s29 = smov 128   ;;  %s1286_s30 = smov 8  }
 0x1e2   : > { %1140 = dma.vmem_to_hbm [thread:$0]  (%p1352_p4), %s1477_s5, 1536, %s1473_s8, %s1483_s18, %s1285_s29, %s1285_s29, %s1286_s30  }
 0x1e3 PF: > { %p1146_p0 = scmp.ge.s32.totalorder %s1282_s20, 2  ;;  %s909_s6 = sand.u32 1, %s1262_s15  }
 0x1e4   : > { %s910_s7 = scalar_lea.sflag [#allocation4], %s909_s6 }
 0x1e5   : > { %p1143_p1 = pnand %p1146_p0, %p1359_p8 }
 0x1e7   : > { %p1144_p2 = pneg %p1143_p1 }
 0x1e9   : > { %1257 = dma.done.wait (%p1144_p2), %s910_s7, 1536  }
 0x1ea   : > { %1259 = vsyncadd (%p1144_p2), %s910_s7, 4294965760  ;;  %s17_s20 = sadd.s32 1, %s1282_s20   ;;  %s1535_s15 = smov %s1266_s16 }
 0x1eb   : > { %p14_p3 = scmp.ge.s32.totalorder %s17_s20, 4   ;;  %s1536_s16 = smov %s1270_s17 }
 0x1ec   : > { %s1537_s17 = smov %s1365_s28  ;;  %s1538_s18 = smov %s1278_s19 }
 0x1ed   : > { %s1539_s19 = smov %s1541_s23  ;;  %16 = sbr.rel (!%p14_p3) target bundleno = 4 (0x4), region = 86 }
 0x1f2   :  { %915 = vsyncpa [#allocation4], 1 }
 0x1f3   :  { %917 = vsyncpa [#allocation4 + $0x1], 1 }

</bundles_post_ra>
